<compile_context>
chip_gen: v7x
topology: tpu7x:2x2x1
jax: 0.10.0
libtpu: 0.0.40
codegen_flags: <defaults>
</compile_context>

<pallas_src>
import numpy as np
import jax
import jax.numpy as jnp
from jax.experimental import pallas as pl
from jax.experimental.pallas import tpu as pltpu


def _dma_copy_kernel(x_hbm_ref, o_hbm_ref, sem):
    # Raw HBM→HBM DMA of the whole array; never touches vregs or VMEM.
    copy = pltpu.make_async_copy(x_hbm_ref, o_hbm_ref, sem)
    copy.start()
    copy.wait()


def _pallas_hbm_to_hbm_copy(x):
    """Materialize a fresh HBM buffer holding a bit-exact copy of `x`."""
    nbytes = int(x.size) * jnp.dtype(x.dtype).itemsize
    return pl.pallas_call(
        _dma_copy_kernel,
        out_shape=jax.ShapeDtypeStruct(x.shape, x.dtype),
        in_specs=[pl.BlockSpec(memory_space=pl.ANY)],
        out_specs=pl.BlockSpec(memory_space=pl.ANY),
        scratch_shapes=[pltpu.SemaphoreType.DMA],
        cost_estimate=pl.CostEstimate(
            flops=0, transcendentals=0, bytes_accessed=2 * nbytes
        ),
    )(x)


class View:
    """JAX/Pallas equivalent of the PyTorch View module."""

    def __init__(self, shape, *shape_, use_pallas_copy=False):
        if isinstance(shape, list):
            self.shape = tuple(shape)
        else:
            self.shape = (shape,) + shape_
        self.use_pallas_copy = use_pallas_copy

    def _resolve_shape(self, n_elems):
        shape = list(self.shape)
        neg = [i for i, s in enumerate(shape) if s == -1]
        if len(neg) > 1:
            raise ValueError("View: at most one dimension may be -1")
        if neg:
            known = 1
            for s in shape:
                if s != -1:
                    known *= int(s)
            if known == 0 or n_elems % known != 0:
                raise ValueError(
                    f"View: cannot infer -1 dim ({n_elems} not divisible by {known})"
                )
            shape[neg[0]] = n_elems // known
        target = tuple(int(s) for s in shape)
        if int(np.prod(target)) != n_elems:
            raise ValueError("View: element count mismatch")
        return target

    def __call__(self, x):
        n = int(x.size)
        target = self._resolve_shape(n)

        if not self.use_pallas_copy:
            # Default: a view of a contiguous tensor is metadata only.
            return jnp.reshape(x, target)

        # Kernel path: one HBM->HBM DMA (bit-exact, dtype-preserving, no
        # padding or tail slicing), then a metadata-only reshape.
        copied = _pallas_hbm_to_hbm_copy(x)
        return jnp.reshape(copied, target)


if __name__ == "__main__":
    key = jax.random.PRNGKey(0)

    # Typical VAE usage: flatten conv feature maps (NCHW) to (N, C*H*W).
    x = jax.random.normal(key, (2, 4, 16, 16), dtype=jnp.float32)
    ref = jnp.reshape(x, (2, 4 * 16 * 16))

    # Default (metadata-only) path.
    view = View(2, 4 * 16 * 16)
    y_default = jax.block_until_ready(view(x))
    assert y_default.shape == (2, 1024) and y_default.dtype == x.dtype
    np.testing.assert_array_equal(np.asarray(y_default), np.asarray(ref))

    # Pallas kernel path (explicit HBM->HBM DMA copy, -1 inference).
    view_k = View(2, -1, use_pallas_copy=True)
    y_kernel = jax.block_until_ready(view_k(x))
    assert y_kernel.shape == (2, 1024) and y_kernel.dtype == x.dtype
    np.testing.assert_array_equal(np.asarray(y_kernel), np.asarray(ref))

    # "Ragged" shape (element count not a multiple of 8*128): no padding or
    # post-kernel slicing is needed on the DMA path.
    x2 = jax.random.normal(jax.random.PRNGKey(1), (3, 5, 7), dtype=jnp.float32)
    ref2 = jnp.reshape(x2, (7, 15))
    view_r = View(7, -1, use_pallas_copy=True)
    y_ragged = jax.block_until_ready(view_r(x2))
    assert y_ragged.shape == (7, 15) and y_ragged.dtype == x2.dtype
    np.testing.assert_array_equal(np.asarray(y_ragged), np.asarray(ref2))

    print("KERNEL_OK")
</pallas_src>

<mosaic_0001>
module attributes {stable_mosaic.version = 11 : i64} {
  func.func @_dma_copy_kernel(%arg0: memref<2x4x16x16xf32, #tpu.memory_space<any>>, %arg1: memref<2x4x16x16xf32, #tpu.memory_space<any>>, %arg2: memref<!tpu.dma_semaphore, #tpu.memory_space<semaphore_mem>>) attributes {dimension_semantics = [], scalar_prefetch = 0 : i64, scratch_operands = 1 : i64, tpu.core_type = #tpu.core_type<tc>} {
    tpu.enqueue_dma source(%arg0 : memref<2x4x16x16xf32, #tpu.memory_space<any>>) target(%arg1 : memref<2x4x16x16xf32, #tpu.memory_space<any>>) target_semaphore(%arg2 : memref<!tpu.dma_semaphore, #tpu.memory_space<semaphore_mem>>)
    tpu.wait_dma2 semaphore(%arg2 : memref<!tpu.dma_semaphore, #tpu.memory_space<semaphore_mem>>) src(%arg0 : memref<2x4x16x16xf32, #tpu.memory_space<any>>) dst(%arg1 : memref<2x4x16x16xf32, #tpu.memory_space<any>>)
    return
  }
}

</mosaic_0001>

<bundles_post_ra>
// kernel: tpu_custom_call.1
= control target key start
LH: loop header
LB: loop body
LE: loop exit
PB: predicated region body
PF: predicated region fallthrough
CT: control target
= control target key end

     0   :  { %s36_s6 = smov [#allocation2]   ;;  %s37_s7 = smov [#allocation3]   ;;  %s55_s0 = inlined_call_operand.hbm [shape: f32[2,4,16,16], index: 0, kind: input, shape index: {}]   ;;  %s56_s1 = inlined_call_operand.hbm [shape: f32[2,4,16,16], index: 1, kind: output, shape index: {}]  }
   0x1   :  { %s38_s8 = smov 0  }
   0x2   :  { %18 = dma.general %s55_s0, 2048, %s56_s1, %s36_s6, %s37_s7, [#allocation4], %s38_s8, 0  }
   0x3   :  { %34 = dma.done.wait [#allocation2], 2048 }
   0x4   :  { %35 = vsyncadd [#allocation2], 4294965248 }
   0x5   :  { %24 = vsyncmov [#allocation2] }
   0x8   :  { %s25_s13 = vpop.sfrf %24 }
   0x9   :  { %p30_p0 = scmp.ne.s32.totalorder %s25_s13, 0 }
   0xb   :  { %29 = shalt.err (%p30_p0)  }

</bundles_post_ra>
